<compile_context>
chip_gen: v7x
topology: tpu7x:2x2x1
jax: 0.10.0
libtpu: 0.0.40
codegen_flags: <defaults>
</compile_context>

<pallas_src>
import math

import jax
import jax.numpy as jnp
from jax.experimental import pallas as pl
from jax.experimental.pallas import tpu as pltpu


def make_sinusoidal_pe(d_model, max_len=5000, dtype=jnp.float32):
    """Builds the (max_len, d_model) sinusoidal table exactly like the module.

    Build it in the model dtype (e.g. jnp.bfloat16) to halve the pe stream.
    """
    if d_model % 2 != 0:
        # Same limitation as the PyTorch snippet (its cos assignment would fail).
        raise ValueError(f"d_model must be even, got {d_model}")
    pos = jnp.arange(max_len, dtype=jnp.float32)[:, None]            # (max_len, 1)
    i2 = jnp.arange(0, d_model, 2, dtype=jnp.float32)                # (d_model/2,)
    div = jnp.exp(i2 * (-math.log(10000.0) / d_model))
    pe = jnp.zeros((max_len, d_model), jnp.float32)
    pe = pe.at[:, 0::2].set(jnp.sin(pos * div))
    pe = pe.at[:, 1::2].set(jnp.cos(pos * div))
    return pe.astype(dtype)


def _pe_add_kernel(x_ref, pe_ref, o_ref):
    # x_ref / pe_ref / o_ref: (tile_rows, cols); pe already in x's dtype.
    o_ref[...] = x_ref[...] + pe_ref[...]


def _round_up(v, m):
    return (v + m - 1) // m * m


def _pick_tile_rows(n_rows, row_bytes, *, n_buffers=6, vmem_budget=10 << 20,
                    min_steps=8):
    """Row tile: multiple of 8, sized so ALL double-buffered streams
    (x, out, pe -> n_buffers tiles) fit in ~vmem_budget, and capped so the grid
    has >= min_steps steps (pipelining + v7x dual-TensorCore sharding)."""
    if n_rows <= 8:
        return int(n_rows)                      # full dim -> always a legal block
    per_buffer = vmem_budget // n_buffers
    t_vmem = max(8, (per_buffer // max(int(row_bytes), 1)) // 8 * 8)
    t_steps = max(8, _round_up(pl.cdiv(n_rows, min_steps), 8))
    return int(min(t_vmem, t_steps, _round_up(n_rows, 8)))


def positional_encoding(x, pe, *, tile_rows=None):
    """y = x + pe[:seq_len]   (PositionalEncoding.forward).

    x:  (S, D) per the literal spec, or (B, S, D) batch-first.
    pe: (max_len, D) sinusoidal buffer with max_len >= S.
    """
    squeeze_batch = x.ndim == 2
    if squeeze_batch:
        x = x[None]                                     # free metadata reshape
    if x.ndim != 3:
        raise ValueError(f"expected x of rank 2 or 3, got shape {x.shape}")
    B, S, D = x.shape
    max_len = pe.shape[0]
    if pe.ndim != 2 or pe.shape[1] != D or max_len < S:
        raise ValueError(f"pe shape {pe.shape} incompatible with x shape {x.shape}")

    # One-time cast so the kernel streams pe at the activation width.
    if pe.dtype != x.dtype:
        pe = pe.astype(x.dtype)

    # ---- pick a lane-dense 2-D view of the problem -------------------------
    if D % 128 == 0:
        rows, cols = S, D
        x2, pe_src = x, pe
    elif (S * D) % 128 == 0:
        rows, cols = (S * D) // 128, 128
        x2 = x.reshape(B, rows, cols)                   # free contiguous reshape
        if (max_len * D) % 128 == 0:
            pe_src = pe.reshape(-1, 128)                # free reshape of full table
        else:
            pe_src = pe[:S].reshape(rows, 128)          # tiny slice copy
    else:
        rows, cols = S, D                               # fallback: masked lanes
        x2, pe_src = x, pe

    itemsize = x.dtype.itemsize
    tr = int(tile_rows) if tile_rows is not None else _pick_tile_rows(rows, cols * itemsize)
    n_tiles = pl.cdiv(rows, tr)

    # If the tile rows are not a multiple of 8 (tiny sequences), make the pe
    # block equal to pe's full dims so the (8,128) block rule is satisfied.
    if tr % 8 == 0:
        pe2 = pe_src                                    # windowed by index_map
    else:
        pe2 = pe_src[:rows]

    footprint = 6 * tr * cols * itemsize                # 3 streams x double buffer
    compiler_params = pltpu.CompilerParams(
        dimension_semantics=("parallel", "parallel"),
        vmem_limit_bytes=int(min(max(2 * footprint, 16 << 20), 32 << 20)),
    )
    cost = pl.CostEstimate(
        flops=B * S * D,
        transcendentals=0,
        bytes_accessed=(2 * B * S * D + S * D) * itemsize,
    )

    out2 = pl.pallas_call(
        _pe_add_kernel,
        out_shape=jax.ShapeDtypeStruct((B, rows, cols), x.dtype),
        grid=(n_tiles, B),                               # b innermost: pe tile reused
        in_specs=[
            pl.BlockSpec((None, tr, cols), lambda i, b: (b, i, 0)),  # x tile (B squeezed)
            pl.BlockSpec((tr, cols), lambda i, b: (i, 0)),           # pe window
        ],
        out_specs=pl.BlockSpec((None, tr, cols), lambda i, b: (b, i, 0)),
        compiler_params=compiler_params,
        cost_estimate=cost,
    )(x2, pe2)

    out = out2.reshape(B, S, D)
    return out[0] if squeeze_batch else out


if __name__ == "__main__":
    MAX_LEN = 5000
    D = 32
    S, B = 8, 2

    key = jax.random.PRNGKey(0)
    k1, k2, k3, k4 = jax.random.split(key, 4)

    pe = make_sinusoidal_pe(D, MAX_LEN)

    # 1) Literal-spec path: x of shape (S, d_model) -> lane-dense (rows, 128) view.
    x2 = jax.random.normal(k1, (S, D), dtype=jnp.float32)
    y2 = jax.block_until_ready(positional_encoding(x2, pe))
    assert y2.shape == (S, D)
    assert jnp.allclose(y2, x2 + pe[:S], atol=1e-6), "2D path mismatch"

    # 2) Batch-first path: x of shape (B, S, d_model), pe broadcast over B
    #    (the only batched broadcast torch's `x + emb` accepts).
    x3 = jax.random.normal(k2, (B, S, D), dtype=jnp.float32)
    y3 = jax.block_until_ready(positional_encoding(x3, pe))
    assert jnp.allclose(y3, x3 + pe[:S][None], atol=1e-6), "3D path mismatch"

    # 3) Multi-tile grid with lane-aligned d_model (heuristic tiling).
    D2, S2 = 128, 96
    pe_big = make_sinusoidal_pe(D2, MAX_LEN)
    x4 = jax.random.normal(k3, (B, S2, D2), dtype=jnp.float32)
    y4 = jax.block_until_ready(positional_encoding(x4, pe_big))
    assert jnp.allclose(y4, x4 + pe_big[:S2][None], atol=1e-6), "multi-tile mismatch"

    # 4) Explicit tile override + bf16 activations (pe cast once wrapper-side).
    x5 = jax.random.normal(k4, (B, S2, D2), dtype=jnp.bfloat16)
    y5 = jax.block_until_ready(positional_encoding(x5, pe_big, tile_rows=32))
    ref5 = x5 + pe_big[:S2][None].astype(jnp.bfloat16)
    assert y5.dtype == jnp.bfloat16
    assert jnp.allclose(y5.astype(jnp.float32), ref5.astype(jnp.float32),
                        atol=1e-2), "bf16 path mismatch"

    # TODO(synk): the module's `print(emb.shape)` debug statement is host-side
    # Python I/O and is intentionally not reproduced inside the kernel.
    print("KERNEL_OK")
</pallas_src>

<mosaic_0001>
module attributes {stable_mosaic.version = 11 : i64} {
  func.func @_pe_add_kernel(%arg0: i32, %arg1: i32, %arg2: memref<1x2x128xf32, #tpu.memory_space<vmem>>, %arg3: memref<2x128xf32, #tpu.memory_space<vmem>>, %arg4: memref<1x2x128xf32, #tpu.memory_space<vmem>>) attributes {dimension_semantics = [#tpu.dimension_semantics<parallel>, #tpu.dimension_semantics<parallel>], iteration_bounds = array<i64: 1, 1>, scalar_prefetch = 0 : i64, scratch_operands = 0 : i64, tpu.core_type = #tpu.core_type<tc>, window_params = [{transform_indices = @transform_0, window_bounds = array<i64: 1, 2, 128>}, {transform_indices = @transform_1, window_bounds = array<i64: 2, 128>}, {transform_indices = @transform_2, window_bounds = array<i64: 1, 2, 128>}]} {
    %c0 = arith.constant 0 : index
    %c0_0 = arith.constant 0 : index
    %c0_1 = arith.constant 0 : index
    %0 = vector.load %arg2[%c0, %c0_0, %c0_1] : memref<1x2x128xf32, #tpu.memory_space<vmem>>, vector<1x2x128xf32>
    %1 = vector.shape_cast %0 : vector<1x2x128xf32> to vector<2x128xf32>
    %c0_2 = arith.constant 0 : index
    %c0_3 = arith.constant 0 : index
    %2 = vector.load %arg3[%c0_2, %c0_3] : memref<2x128xf32, #tpu.memory_space<vmem>>, vector<2x128xf32>
    %3 = arith.addf %1, %2 : vector<2x128xf32>
    %c0_4 = arith.constant 0 : index
    %c0_5 = arith.constant 0 : index
    %c0_6 = arith.constant 0 : index
    %4 = vector.load %arg4[%c0_4, %c0_5, %c0_6] : memref<1x2x128xf32, #tpu.memory_space<vmem>>, vector<1x2x128xf32>
    %5 = vector.shape_cast %4 : vector<1x2x128xf32> to vector<2x128xf32>
    %6 = vector.shape_cast %3 : vector<2x128xf32> to vector<1x2x128xf32>
    tpu.vector_store %arg4[%c0_4, %c0_5, %c0_6], %6 {strides = array<i32>} : memref<1x2x128xf32, #tpu.memory_space<vmem>>, vector<1x2x128xf32>,
    return
  }
  func.func @transform_0(%arg0: i32, %arg1: i32) -> (i32, i32, i32) {
    %c0_i32 = arith.constant 0 : i32
    %c0_i32_0 = arith.constant 0 : i32
    return %arg1, %arg0, %c0_i32 : i32, i32, i32
  }
  func.func @transform_1(%arg0: i32, %arg1: i32) -> (i32, i32) {
    %c0_i32 = arith.constant 0 : i32
    %c0_i32_0 = arith.constant 0 : i32
    return %arg0, %c0_i32 : i32, i32
  }
  func.func @transform_2(%arg0: i32, %arg1: i32) -> (i32, i32, i32) {
    %c0_i32 = arith.constant 0 : i32
    %c0_i32_0 = arith.constant 0 : i32
    return %arg1, %arg0, %c0_i32 : i32, i32, i32
  }
}

</mosaic_0001>

<bundles_post_ra>
// kernel: tpu_custom_call.1
= control target key start
LH: loop header
LB: loop body
LE: loop exit
PB: predicated region body
PF: predicated region fallthrough
CT: control target
= control target key end

     0   :  { %7 = vsyncpa [#allocation3], 0  ;;  %s137_s0 = inlined_call_operand.hbm [shape: f32[1,2,128], index: 0, kind: input, shape index: {}]   ;;  %s138_s1 = inlined_call_operand.vmem [shape: f32[2,128], index: 1, kind: input, shape index: {}]   ;;  %s139_s2 = inlined_call_operand.hbm [shape: f32[1,2,128], index: 2, kind: output, shape index: {}]  }
   0x1   :  { %8 = vsyncpa [#allocation4], 0  ;;  %s93_s9 = smov [#allocation2]   ;;  %s45_s13 = scalar_lea.hbm %s137_s0, 32 }
   0x2   :  { %s15_s10 = sshll.u32 %s93_s9, 4  ;;  %p46_p0 = scmp.ne.s32.totalorder %s137_s0, %s45_s13  ;;  %s16_s10 = int_to_ptr.vmem [resolvable:$true] %s15_s10 }
   0x3   :  { %p49_p1 = scmp.lt.u32.totalorder %s45_s13, %s137_s0 }
   0x5   :  { %p51_p2 = pnand %p49_p1, %p46_p0 }
   0x7   :  { %54 = shalt.err (!%p51_p2)
}
   0x8   :  { %s55_s18 = scalar_lea.vmem %s16_s10, 32  ;;  %p60_p4 = scmp.lt.s32.totalorder %s16_s10, %s16_s10 }
   0x9   :  { %p56_p3 = scmp.ne.s32.totalorder %s16_s10, %s55_s18  ;;  %p61_p5 = scmp.lt.s32.totalorder %s55_s18, %s55_s18 }
   0xb   :  { %p62_p6 = por %p61_p5, %p60_p4 }
   0xd   :  { %p63_p7 = pnand %p62_p6, %p56_p3 }
   0xf   :  { %66 = shalt.err (!%p63_p7)
}
  0x10   :  { %18 = dma.hbm_to_vmem [thread:$0]  %s137_s0, 32, %s16_s10, [#allocation3]  }
  0x11   :  { %89 = dma.done.wait [#allocation3], 32  }
  0x12   :  { %90 = vsyncadd [#allocation3], 4294967264  ;;  %s94_s21 = smov [#allocation5]   ;;  %v24_v0 = vld [vmem:[#allocation2] sm:$0x3] }
  0x13   :  { %s34_s22 = sshll.u32 %s94_s21, 4  ;;  %v25_v1 = vld [vmem:[%s138_s1] sm:$0x3]  ;;  %s35_s22 = int_to_ptr.vmem [resolvable:$true] %s34_s22 }
  0x14   :  { %v26_v2 = vadd.f32 %v25_v1, %v24_v0  ;;  %s67_s25 = scalar_lea.vmem %s35_s22, 32  ;;  %p72_p9 = scmp.lt.s32.totalorder %s35_s22, %s35_s22 }
  0x15   :  { %p68_p8 = scmp.ne.s32.totalorder %s35_s22, %s67_s25  ;;  %p73_p10 = scmp.lt.s32.totalorder %s67_s25, %s67_s25 }
  0x16   :  { %27 = vst [vmem:[#allocation5] sm:$0x3] %v26_v2 }
  0x17   :  { %p74_p11 = por %p73_p10, %p72_p9 }
  0x19   :  { %p75_p12 = pnand %p74_p11, %p68_p8 }
  0x1b   :  { %78 = shalt.err (!%p75_p12)
}
  0x1c   :  { %s79_s27 = scalar_lea.hbm %s139_s2, 32 }
  0x1d   :  { %p80_p13 = scmp.ne.s32.totalorder %s139_s2, %s79_s27  ;;  %p83_p0 = scmp.lt.u32.totalorder %s79_s27, %s139_s2 }
  0x1f   :  { %p85_p1 = pnand %p83_p0, %p80_p13 }
  0x21   :  { %88 = shalt.err (!%p85_p1)
}
  0x22   :  { %37 = dma.vmem_to_hbm [thread:$0]  %s35_s22, 32, %s139_s2, [#allocation4]  }
  0x23   :  { %91 = dma.done.wait [#allocation4], 32  }
  0x24   :  { %92 = vsyncadd [#allocation4], 4294967264 }
  0x25   :  { %41 = vsyncpa [#allocation3], 1 }
  0x26   :  { %42 = vsyncpa [#allocation4], 1 }

</bundles_post_ra>
